<compile_context>
chip_gen: v7x
topology: tpu7x:2x2x1
jax: 0.10.0
libtpu: 0.0.40
codegen_flags: <defaults>
</compile_context>

<pallas_src>
import jax
import jax.numpy as jnp
from jax.experimental import pallas as pl
from jax.experimental.pallas import tpu as pltpu


# ---------------- model dims (small, synthetic) ----------------
B = 2        # batch
S = 8        # sequence length
H = 32       # hidden size
F = 4 * H    # MLP inner size
V = 128      # vocab size (lane-dense output)
BS = B * S   # fused row dim for the GEMM path


def _layernorm(x, gamma, beta, eps=1e-5):
    # f32 elementwise path (VPU/EUP); rsqrt goes to the EUP slot.
    mu = jnp.mean(x, axis=-1, keepdims=True)
    var = jnp.mean((x - mu) ** 2, axis=-1, keepdims=True)
    return (x - mu) * jax.lax.rsqrt(var + eps) * gamma + beta


def _causal_lm_kernel(x_ref, wqkv_ref, wo_ref, w1_ref, w2_ref, ln_ref, wlm_ref,
                      out_ref):
    # Single invocation: x_ref is (B*S, H) f32; weights are bf16; out is (B*S, V) f32.
    lnp = ln_ref[...]                       # (8, H) f32: rows 0..5 = g1,b1,g2,b2,gf,bf
    g1, b1 = lnp[0:1, :], lnp[1:2, :]
    g2, b2 = lnp[2:3, :], lnp[3:4, :]
    gf, bf = lnp[4:5, :], lnp[5:6, :]

    h = x_ref[...].astype(jnp.float32)      # (B*S, H)

    # ---- pre-LN single-head causal self-attention ----
    a = _layernorm(h, g1, b1)                                            # (B*S, H) f32
    qkv = jnp.dot(a.astype(jnp.bfloat16), wqkv_ref[...],
                  preferred_element_type=jnp.float32)                    # (B*S, 3H) f32
    qkv = qkv.reshape(B, S, 3 * H)
    q = qkv[:, :, 0:H]
    k = qkv[:, :, H:2 * H]
    v = qkv[:, :, 2 * H:3 * H]

    scale = 1.0 / jnp.sqrt(jnp.float32(H))
    # Contract on the feature axis directly (batched dot_general; no k.T / XLU vxpose).
    scores = jnp.einsum('bqh,bkh->bqk',
                        q.astype(jnp.bfloat16), k.astype(jnp.bfloat16),
                        preferred_element_type=jnp.float32) * scale      # (B, S, S) f32

    row = jax.lax.broadcasted_iota(jnp.int32, (B, S, S), 1)
    col = jax.lax.broadcasted_iota(jnp.int32, (B, S, S), 2)
    scores = jnp.where(col <= row, scores, jnp.float32(-1e30))

    scores = scores - jnp.max(scores, axis=-1, keepdims=True)
    p = jnp.exp(scores)
    p = p * pl.reciprocal(jnp.sum(p, axis=-1, keepdims=True), approx=True)

    attn = jnp.einsum('bqk,bkh->bqh',
                      p.astype(jnp.bfloat16), v.astype(jnp.bfloat16),
                      preferred_element_type=jnp.float32)                # (B, S, H) f32
    attn = attn.reshape(BS, H)
    h = h + jnp.dot(attn.astype(jnp.bfloat16), wo_ref[...],
                    preferred_element_type=jnp.float32)

    # ---- pre-LN GELU MLP ----
    # TODO(synk): PyTorch nn.GELU defaults to exact erf GELU; we keep the tanh
    # approximation (guaranteed Mosaic lowering) -> tiny numeric delta.
    m = _layernorm(h, g2, b2)
    inner = jax.nn.gelu(jnp.dot(m.astype(jnp.bfloat16), w1_ref[...],
                                preferred_element_type=jnp.float32))
    h = h + jnp.dot(inner.astype(jnp.bfloat16), w2_ref[...],
                    preferred_element_type=jnp.float32)

    # ---- final LN + lm_head (lane-dense V=128 output) ----
    f = _layernorm(h, gf, bf)
    logits = jnp.dot(f.astype(jnp.bfloat16), wlm_ref[...],
                     preferred_element_type=jnp.float32)                 # (B*S, V)

    out_ref[...] = logits.astype(out_ref.dtype)


@jax.jit
def causal_lm_forward(x_emb, params):
    """x_emb: [B, S, H] float32 embedded tokens -> logits [B, S, V] float32."""
    wqkv, wo, w1, w2, ln_pack, wlm = params
    x2 = x_emb.reshape(BS, H)                       # free layout reshape outside kernel
    logits = pl.pallas_call(
        _causal_lm_kernel,
        out_shape=jax.ShapeDtypeStruct((BS, V), jnp.float32),
        in_specs=[pl.BlockSpec(memory_space=pltpu.MemorySpace.VMEM)] * 7,
        out_specs=pl.BlockSpec(memory_space=pltpu.MemorySpace.VMEM),
    )(x2, wqkv, wo, w1, w2, ln_pack, wlm)
    return logits.reshape(B, S, V)
    # TODO(synk): if GRPO only consumes chosen-token log-probs, fuse the
    # log-softmax + gather in-kernel to avoid writing full (B,S,V) logits.


def init_params(key):
    ks = jax.random.split(key, 8)
    s = 0.02
    embed = jax.random.normal(ks[0], (V, H), jnp.float32) * s
    # MXU matmul weights stored in bf16 (halves DMA bytes / vreg footprint).
    wqkv = (jax.random.normal(ks[1], (H, 3 * H), jnp.float32) * s).astype(jnp.bfloat16)
    wo = (jax.random.normal(ks[2], (H, H), jnp.float32) * s).astype(jnp.bfloat16)
    w1 = (jax.random.normal(ks[3], (H, F), jnp.float32) * s).astype(jnp.bfloat16)
    w2 = (jax.random.normal(ks[4], (F, H), jnp.float32) * s).astype(jnp.bfloat16)
    wlm = (jax.random.normal(ks[5], (H, V), jnp.float32) * s).astype(jnp.bfloat16)
    # Pack 6 LN vectors into one sublane-aligned (8, H) slab:
    # rows: 0=g1, 1=b1, 2=g2, 3=b2, 4=gf, 5=bf, 6/7 unused padding.
    ln_pack = jnp.zeros((8, H), jnp.float32)
    ln_pack = ln_pack.at[0].set(1.0).at[2].set(1.0).at[4].set(1.0)
    return embed, (wqkv, wo, w1, w2, ln_pack, wlm)


class GRPOModelWrapper:
    """JAX analogue of the PyTorch GRPOModelWrapper: drops `num_logits_to_keep`
    and forwards everything else to the wrapped model; attribute access falls
    through to the wrapped model."""

    def __init__(self, model):
        object.__setattr__(self, "model", model)
        object.__setattr__(self, "config", getattr(model, "config", None))

    def __call__(self, *args, **kwargs):
        kwargs.pop("num_logits_to_keep", None)   # exact wrapper semantics
        return self.model(*args, **kwargs)

    def __getattr__(self, name):
        return getattr(object.__getattribute__(self, "model"), name)


class TinyCausalLM:
    """Synthetic wrapped causal LM whose hot path runs in the Pallas kernel."""

    def __init__(self, embed, params):
        self.embed = embed
        self.params = params
        self.config = {"vocab_size": V, "hidden_size": H, "seq_len": S}

    def __call__(self, input_ids, **kwargs):
        # embedding lookup (glue, plain JAX); kernel does the block + lm_head
        x_emb = jnp.take(self.embed, input_ids, axis=0)       # [B, S, H]
        return causal_lm_forward(x_emb, self.params)           # [B, S, V]


if __name__ == "__main__":
    key = jax.random.PRNGKey(0)
    k_init, k_ids = jax.random.split(key)

    embed, params = init_params(k_init)
    model = TinyCausalLM(embed, params)
    wrapped = GRPOModelWrapper(model)

    input_ids = jax.random.randint(k_ids, (B, S), 0, V, dtype=jnp.int32)

    # GRPO trainer passes num_logits_to_keep; wrapper must drop it.
    logits = wrapped(input_ids, num_logits_to_keep=1)
    logits = jax.block_until_ready(logits)

    assert logits.shape == (B, S, V), logits.shape
    assert jnp.all(jnp.isfinite(logits))
    print("KERNEL_OK")
</pallas_src>

<mosaic_0001>
module attributes {stable_mosaic.version = 11 : i64} {
  func.func @_causal_lm_kernel(%arg0: memref<16x32xf32, #tpu.memory_space<vmem>>, %arg1: memref<32x96xbf16, #tpu.memory_space<vmem>>, %arg2: memref<32x32xbf16, #tpu.memory_space<vmem>>, %arg3: memref<32x128xbf16, #tpu.memory_space<vmem>>, %arg4: memref<128x32xbf16, #tpu.memory_space<vmem>>, %arg5: memref<8x32xf32, #tpu.memory_space<vmem>>, %arg6: memref<32x128xbf16, #tpu.memory_space<vmem>>, %arg7: memref<16x128xf32, #tpu.memory_space<vmem>>) attributes {dimension_semantics = [], scalar_prefetch = 0 : i64, scratch_operands = 0 : i64, tpu.core_type = #tpu.core_type<tc>} {
    %c0 = arith.constant 0 : index
    %c0_0 = arith.constant 0 : index
    %0 = vector.load %arg5[%c0, %c0_0] : memref<8x32xf32, #tpu.memory_space<vmem>>, vector<8x32xf32>
    %1 = vector.extract_strided_slice %0 {offsets = [0, 0], sizes = [1, 32], strides = [1, 1]} : vector<8x32xf32> to vector<1x32xf32>
    %2 = vector.extract_strided_slice %0 {offsets = [1, 0], sizes = [1, 32], strides = [1, 1]} : vector<8x32xf32> to vector<1x32xf32>
    %3 = vector.extract_strided_slice %0 {offsets = [2, 0], sizes = [1, 32], strides = [1, 1]} : vector<8x32xf32> to vector<1x32xf32>
    %4 = vector.extract_strided_slice %0 {offsets = [3, 0], sizes = [1, 32], strides = [1, 1]} : vector<8x32xf32> to vector<1x32xf32>
    %5 = vector.extract_strided_slice %0 {offsets = [4, 0], sizes = [1, 32], strides = [1, 1]} : vector<8x32xf32> to vector<1x32xf32>
    %6 = vector.extract_strided_slice %0 {offsets = [5, 0], sizes = [1, 32], strides = [1, 1]} : vector<8x32xf32> to vector<1x32xf32>
    %c0_1 = arith.constant 0 : index
    %c0_2 = arith.constant 0 : index
    %7 = vector.load %arg0[%c0_1, %c0_2] : memref<16x32xf32, #tpu.memory_space<vmem>>, vector<16x32xf32>
    %cst = arith.constant dense<0.000000e+00> : vector<16xf32>
    %8 = vector.multi_reduction <add>, %7, %cst [1] : vector<16x32xf32> to vector<16xf32>
    %9 = vector.shape_cast %8 : vector<16xf32> to vector<16x1xf32>
    %cst_3 = arith.constant 3.200000e+01 : f32
    %10 = vector.broadcast %cst_3 : f32 to vector<16x1xf32>
    %11 = arith.divf %9, %10 : vector<16x1xf32>
    %12 = vector.broadcast %11 : vector<16x1xf32> to vector<16x32xf32>
    %13 = arith.subf %7, %12 : vector<16x32xf32>
    %14 = arith.mulf %13, %13 : vector<16x32xf32>
    %cst_4 = arith.constant dense<0.000000e+00> : vector<16xf32>
    %15 = vector.multi_reduction <add>, %14, %cst_4 [1] : vector<16x32xf32> to vector<16xf32>
    %16 = vector.shape_cast %15 : vector<16xf32> to vector<16x1xf32>
    %cst_5 = arith.constant 3.200000e+01 : f32
    %17 = vector.broadcast %cst_5 : f32 to vector<16x1xf32>
    %18 = arith.divf %16, %17 : vector<16x1xf32>
    %19 = vector.broadcast %11 : vector<16x1xf32> to vector<16x32xf32>
    %20 = arith.subf %7, %19 : vector<16x32xf32>
    %cst_6 = arith.constant 9.99999974E-6 : f32
    %21 = vector.broadcast %cst_6 : f32 to vector<16x1xf32>
    %22 = arith.addf %18, %21 : vector<16x1xf32>
    %23 = math.rsqrt %22 : vector<16x1xf32>
    %24 = vector.broadcast %23 : vector<16x1xf32> to vector<16x32xf32>
    %25 = arith.mulf %20, %24 : vector<16x32xf32>
    %26 = vector.broadcast %1 : vector<1x32xf32> to vector<16x32xf32>
    %27 = arith.mulf %25, %26 : vector<16x32xf32>
    %28 = vector.broadcast %2 : vector<1x32xf32> to vector<16x32xf32>
    %29 = arith.addf %27, %28 : vector<16x32xf32>
    %30 = arith.truncf %29 : vector<16x32xf32> to vector<16x32xbf16>
    %c0_7 = arith.constant 0 : index
    %c0_8 = arith.constant 0 : index
    %31 = vector.load %arg1[%c0_7, %c0_8] : memref<32x96xbf16, #tpu.memory_space<vmem>>, vector<32x96xbf16>
    %cst_9 = arith.constant dense<0.000000e+00> : vector<16x96xf32>
    %32 = tpu.matmul %30, %31, %cst_9 {dimension_numbers = #tpu.dot_dimension_numbers<[1], [0], [0], [1], [0, 0, 1, 1], [], []>} : vector<16x32xbf16>, vector<32x96xbf16>, vector<16x96xf32> -> vector<16x96xf32>
    %33 = vector.shape_cast %32 : vector<16x96xf32> to vector<2x8x96xf32>
    %34 = vector.extract_strided_slice %33 {offsets = [0, 0, 0], sizes = [2, 8, 32], strides = [1, 1, 1]} : vector<2x8x96xf32> to vector<2x8x32xf32>
    %35 = vector.extract_strided_slice %33 {offsets = [0, 0, 32], sizes = [2, 8, 32], strides = [1, 1, 1]} : vector<2x8x96xf32> to vector<2x8x32xf32>
    %36 = vector.extract_strided_slice %33 {offsets = [0, 0, 64], sizes = [2, 8, 32], strides = [1, 1, 1]} : vector<2x8x96xf32> to vector<2x8x32xf32>
    %cst_10 = arith.constant 3.200000e+01 : f32
    %37 = math.sqrt %cst_10 : f32
    %cst_11 = arith.constant 1.000000e+00 : f32
    %38 = arith.divf %cst_11, %37 : f32
    %39 = arith.truncf %34 : vector<2x8x32xf32> to vector<2x8x32xbf16>
    %40 = arith.truncf %35 : vector<2x8x32xf32> to vector<2x8x32xbf16>
    "tpu.trace_start"() <{level = 10 : i32, message = "bqh,bkh->bqk"}> : () -> ()
    %cst_12 = arith.constant dense<0.000000e+00> : vector<2x8x8xf32>
    %41 = tpu.matmul %39, %40, %cst_12 {dimension_numbers = #tpu.dot_dimension_numbers<[2], [2], [1], [1], [0, 0, 0, 1, 1, 1], [0], [0]>} : vector<2x8x32xbf16>, vector<2x8x32xbf16>, vector<2x8x8xf32> -> vector<2x8x8xf32>
    "tpu.trace_stop"() : () -> ()
    %42 = vector.broadcast %38 : f32 to vector<2x8x8xf32>
    %43 = arith.mulf %41, %42 : vector<2x8x8xf32>
    %44 = tpu.iota {dimensions = array<i32: 1>} : vector<2x8x8xi32>
    %45 = tpu.iota {dimensions = array<i32: 2>} : vector<2x8x8xi32>
    %46 = arith.cmpi sle, %45, %44 : vector<2x8x8xi32>
    %cst_13 = arith.constant -1.000000e+30 : f32
    %47 = vector.broadcast %cst_13 : f32 to vector<2x8x8xf32>
    %48 = arith.select %46, %43, %47 : vector<2x8x8xi1>, vector<2x8x8xf32>
    %cst_14 = arith.constant dense<0xFF800000> : vector<2x8xf32>
    %49 = vector.multi_reduction <maximumf>, %48, %cst_14 [2] : vector<2x8x8xf32> to vector<2x8xf32>
    %50 = vector.shape_cast %49 : vector<2x8xf32> to vector<2x8x1xf32>
    %51 = vector.broadcast %50 : vector<2x8x1xf32> to vector<2x8x8xf32>
    %52 = arith.subf %48, %51 : vector<2x8x8xf32>
    %53 = math.exp %52 : vector<2x8x8xf32>
    %cst_15 = arith.constant dense<0.000000e+00> : vector<2x8xf32>
    %54 = vector.multi_reduction <add>, %53, %cst_15 [2] : vector<2x8x8xf32> to vector<2x8xf32>
    %55 = vector.shape_cast %54 : vector<2x8xf32> to vector<2x8x1xf32>
    %56 = tpu.reciprocal %55 {approx = true} : vector<2x8x1xf32> -> vector<2x8x1xf32>
    %57 = vector.broadcast %56 : vector<2x8x1xf32> to vector<2x8x8xf32>
    %58 = arith.mulf %53, %57 : vector<2x8x8xf32>
    %59 = arith.truncf %58 : vector<2x8x8xf32> to vector<2x8x8xbf16>
    %60 = arith.truncf %36 : vector<2x8x32xf32> to vector<2x8x32xbf16>
    "tpu.trace_start"() <{level = 10 : i32, message = "bqk,bkh->bqh"}> : () -> ()
    %cst_16 = arith.constant dense<0.000000e+00> : vector<2x8x32xf32>
    %61 = tpu.matmul %59, %60, %cst_16 {dimension_numbers = #tpu.dot_dimension_numbers<[2], [1], [1], [2], [0, 0, 0, 1, 1, 2], [0], [0]>} : vector<2x8x8xbf16>, vector<2x8x32xbf16>, vector<2x8x32xf32> -> vector<2x8x32xf32>
    "tpu.trace_stop"() : () -> ()
    %62 = vector.shape_cast %61 : vector<2x8x32xf32> to vector<16x32xf32>
    %63 = arith.truncf %62 : vector<16x32xf32> to vector<16x32xbf16>
    %c0_17 = arith.constant 0 : index
    %c0_18 = arith.constant 0 : index
    %64 = vector.load %arg2[%c0_17, %c0_18] : memref<32x32xbf16, #tpu.memory_space<vmem>>, vector<32x32xbf16>
    %cst_19 = arith.constant dense<0.000000e+00> : vector<16x32xf32>
    %65 = tpu.matmul %63, %64, %cst_19 {dimension_numbers = #tpu.dot_dimension_numbers<[1], [0], [0], [1], [0, 0, 1, 1], [], []>} : vector<16x32xbf16>, vector<32x32xbf16>, vector<16x32xf32> -> vector<16x32xf32>
    %66 = arith.addf %7, %65 : vector<16x32xf32>
    %cst_20 = arith.constant dense<0.000000e+00> : vector<16xf32>
    %67 = vector.multi_reduction <add>, %66, %cst_20 [1] : vector<16x32xf32> to vector<16xf32>
    %68 = vector.shape_cast %67 : vector<16xf32> to vector<16x1xf32>
    %cst_21 = arith.constant 3.200000e+01 : f32
    %69 = vector.broadcast %cst_21 : f32 to vector<16x1xf32>
    %70 = arith.divf %68, %69 : vector<16x1xf32>
    %71 = vector.broadcast %70 : vector<16x1xf32> to vector<16x32xf32>
    %72 = arith.subf %66, %71 : vector<16x32xf32>
    %73 = arith.mulf %72, %72 : vector<16x32xf32>
    %cst_22 = arith.constant dense<0.000000e+00> : vector<16xf32>
    %74 = vector.multi_reduction <add>, %73, %cst_22 [1] : vector<16x32xf32> to vector<16xf32>
    %75 = vector.shape_cast %74 : vector<16xf32> to vector<16x1xf32>
    %cst_23 = arith.constant 3.200000e+01 : f32
    %76 = vector.broadcast %cst_23 : f32 to vector<16x1xf32>
    %77 = arith.divf %75, %76 : vector<16x1xf32>
    %78 = vector.broadcast %70 : vector<16x1xf32> to vector<16x32xf32>
    %79 = arith.subf %66, %78 : vector<16x32xf32>
    %cst_24 = arith.constant 9.99999974E-6 : f32
    %80 = vector.broadcast %cst_24 : f32 to vector<16x1xf32>
    %81 = arith.addf %77, %80 : vector<16x1xf32>
    %82 = math.rsqrt %81 : vector<16x1xf32>
    %83 = vector.broadcast %82 : vector<16x1xf32> to vector<16x32xf32>
    %84 = arith.mulf %79, %83 : vector<16x32xf32>
    %85 = vector.broadcast %3 : vector<1x32xf32> to vector<16x32xf32>
    %86 = arith.mulf %84, %85 : vector<16x32xf32>
    %87 = vector.broadcast %4 : vector<1x32xf32> to vector<16x32xf32>
    %88 = arith.addf %86, %87 : vector<16x32xf32>
    %89 = arith.truncf %88 : vector<16x32xf32> to vector<16x32xbf16>
    %c0_25 = arith.constant 0 : index
    %c0_26 = arith.constant 0 : index
    %90 = vector.load %arg3[%c0_25, %c0_26] : memref<32x128xbf16, #tpu.memory_space<vmem>>, vector<32x128xbf16>
    %cst_27 = arith.constant dense<0.000000e+00> : vector<16x128xf32>
    %91 = tpu.matmul %89, %90, %cst_27 {dimension_numbers = #tpu.dot_dimension_numbers<[1], [0], [0], [1], [0, 0, 1, 1], [], []>} : vector<16x32xbf16>, vector<32x128xbf16>, vector<16x128xf32> -> vector<16x128xf32>
    %92 = arith.mulf %91, %91 : vector<16x128xf32>
    %93 = arith.mulf %91, %92 : vector<16x128xf32>
    %cst_28 = arith.constant 4.471500e-02 : f32
    %94 = vector.broadcast %cst_28 : f32 to vector<16x128xf32>
    %95 = arith.mulf %94, %93 : vector<16x128xf32>
    %96 = arith.addf %91, %95 : vector<16x128xf32>
    %cst_29 = arith.constant 0.797884583 : f32
    %97 = vector.broadcast %cst_29 : f32 to vector<16x128xf32>
    %98 = arith.mulf %97, %96 : vector<16x128xf32>
    %99 = math.tanh %98 : vector<16x128xf32>
    %cst_30 = arith.constant 1.000000e+00 : f32
    %100 = vector.broadcast %cst_30 : f32 to vector<16x128xf32>
    %101 = arith.addf %100, %99 : vector<16x128xf32>
    %cst_31 = arith.constant 5.000000e-01 : f32
    %102 = vector.broadcast %cst_31 : f32 to vector<16x128xf32>
    %103 = arith.mulf %102, %101 : vector<16x128xf32>
    %104 = arith.mulf %91, %103 : vector<16x128xf32>
    %105 = arith.truncf %104 : vector<16x128xf32> to vector<16x128xbf16>
    %c0_32 = arith.constant 0 : index
    %c0_33 = arith.constant 0 : index
    %106 = vector.load %arg4[%c0_32, %c0_33] : memref<128x32xbf16, #tpu.memory_space<vmem>>, vector<128x32xbf16>
    %cst_34 = arith.constant dense<0.000000e+00> : vector<16x32xf32>
    %107 = tpu.matmul %105, %106, %cst_34 {dimension_numbers = #tpu.dot_dimension_numbers<[1], [0], [0], [1], [0, 0, 1, 1], [], []>} : vector<16x128xbf16>, vector<128x32xbf16>, vector<16x32xf32> -> vector<16x32xf32>
    %108 = arith.addf %66, %107 : vector<16x32xf32>
    %cst_35 = arith.constant dense<0.000000e+00> : vector<16xf32>
    %109 = vector.multi_reduction <add>, %108, %cst_35 [1] : vector<16x32xf32> to vector<16xf32>
    %110 = vector.shape_cast %109 : vector<16xf32> to vector<16x1xf32>
    %cst_36 = arith.constant 3.200000e+01 : f32
    %111 = vector.broadcast %cst_36 : f32 to vector<16x1xf32>
    %112 = arith.divf %110, %111 : vector<16x1xf32>
    %113 = vector.broadcast %112 : vector<16x1xf32> to vector<16x32xf32>
    %114 = arith.subf %108, %113 : vector<16x32xf32>
    %115 = arith.mulf %114, %114 : vector<16x32xf32>
    %cst_37 = arith.constant dense<0.000000e+00> : vector<16xf32>
    %116 = vector.multi_reduction <add>, %115, %cst_37 [1] : vector<16x32xf32> to vector<16xf32>
    %117 = vector.shape_cast %116 : vector<16xf32> to vector<16x1xf32>
    %cst_38 = arith.constant 3.200000e+01 : f32
    %118 = vector.broadcast %cst_38 : f32 to vector<16x1xf32>
    %119 = arith.divf %117, %118 : vector<16x1xf32>
    %120 = vector.broadcast %112 : vector<16x1xf32> to vector<16x32xf32>
    %121 = arith.subf %108, %120 : vector<16x32xf32>
    %cst_39 = arith.constant 9.99999974E-6 : f32
    %122 = vector.broadcast %cst_39 : f32 to vector<16x1xf32>
    %123 = arith.addf %119, %122 : vector<16x1xf32>
    %124 = math.rsqrt %123 : vector<16x1xf32>
    %125 = vector.broadcast %124 : vector<16x1xf32> to vector<16x32xf32>
    %126 = arith.mulf %121, %125 : vector<16x32xf32>
    %127 = vector.broadcast %5 : vector<1x32xf32> to vector<16x32xf32>
    %128 = arith.mulf %126, %127 : vector<16x32xf32>
    %129 = vector.broadcast %6 : vector<1x32xf32> to vector<16x32xf32>
    %130 = arith.addf %128, %129 : vector<16x32xf32>
    %131 = arith.truncf %130 : vector<16x32xf32> to vector<16x32xbf16>
    %c0_40 = arith.constant 0 : index
    %c0_41 = arith.constant 0 : index
    %132 = vector.load %arg6[%c0_40, %c0_41] : memref<32x128xbf16, #tpu.memory_space<vmem>>, vector<32x128xbf16>
    %cst_42 = arith.constant dense<0.000000e+00> : vector<16x128xf32>
    %133 = tpu.matmul %131, %132, %cst_42 {dimension_numbers = #tpu.dot_dimension_numbers<[1], [0], [0], [1], [0, 0, 1, 1], [], []>} : vector<16x32xbf16>, vector<32x128xbf16>, vector<16x128xf32> -> vector<16x128xf32>
    %c0_43 = arith.constant 0 : index
    %c0_44 = arith.constant 0 : index
    %134 = vector.load %arg7[%c0_43, %c0_44] : memref<16x128xf32, #tpu.memory_space<vmem>>, vector<16x128xf32>
    tpu.vector_store %arg7[%c0_43, %c0_44], %133 {strides = array<i32>} : memref<16x128xf32, #tpu.memory_space<vmem>>, vector<16x128xf32>,
    return
  }
}

</mosaic_0001>

<bundles_post_ra>
// kernel: causal_lm_forward.1
= control target key start
LH: loop header
LB: loop body
LE: loop exit
PB: predicated region body
PF: predicated region fallthrough
CT: control target
= control target key end

     0   :  { %12 = vsyncpa [#allocation3], 0  ;;  %s1233_s0 = inlined_call_operand.vmem [shape: f32[16,32], index: 0, kind: input, shape index: {}]   ;;  %s1234_s1 = inlined_call_operand.vmem [shape: bf16[32,96], index: 1, kind: input, shape index: {}]   ;;  %s1235_s2 = inlined_call_operand.vmem [shape: bf16[32,32], index: 2, kind: input, shape index: {}]   ;;  %s1236_s3 = inlined_call_operand.vmem [shape: bf16[32,128], index: 3, kind: input, shape index: {}]   ;;  %s1237_s4 = inlined_call_operand.vmem [shape: bf16[128,32], index: 4, kind: input, shape index: {}]   ;;  %s1238_s5 = inlined_call_operand.hbm [shape: f32[8,32], index: 5, kind: input, shape index: {}]   ;;  %s1239_s6 = inlined_call_operand.vmem [shape: bf16[32,128], index: 6, kind: input, shape index: {}]   ;;  %s1240_s7 = inlined_call_operand.hbm [shape: f32[16,128], index: 7, kind: output, shape index: {}]  }
   0x1   :  { %13 = vsyncpa [#allocation4], 0  ;;  %s1006_s24 = smov [#allocation2]   ;;  %s958_s28 = scalar_lea.hbm %s1238_s5, 128 }
   0x2   :  { %s30_s25 = sshll.u32 %s1006_s24, 4  ;;  %p959_p0 = scmp.ne.s32.totalorder %s1238_s5, %s958_s28  ;;  %s31_s25 = int_to_ptr.vmem [resolvable:$true] %s30_s25 }
   0x3   :  { %p962_p1 = scmp.lt.u32.totalorder %s958_s28, %s1238_s5 }
   0x5   :  { %p964_p2 = pnand %p962_p1, %p959_p0 }
   0x7   :  { %967 = shalt.err (!%p964_p2)
}
   0x8   :  { %s968_s10 = scalar_lea.vmem %s31_s25, 128  ;;  %p973_p4 = scmp.lt.s32.totalorder %s31_s25, %s31_s25 }
   0x9   :  { %p969_p3 = scmp.ne.s32.totalorder %s31_s25, %s968_s10  ;;  %p974_p5 = scmp.lt.s32.totalorder %s968_s10, %s968_s10 }
   0xb   :  { %p975_p6 = por %p974_p5, %p973_p4 }
   0xd   :  { %p976_p7 = pnand %p975_p6, %p969_p3 }
   0xf   :  { %979 = shalt.err (!%p976_p7)
}
  0x10   :  { %33 = dma.hbm_to_vmem [thread:$0]  %s1238_s5, 128, %s31_s25, [#allocation3]  }
  0x11   :  { %1002 = dma.done.wait [#allocation3], 128  }
  0x12   :  { %1003 = vsyncadd [#allocation3], 4294967168  ;;  %vm43_vm0 = vcmask 261120   ;;  %v1069_v0 = vld [vmem:[%s1233_s0] sm:$0xff]  ;;  %v1074_v1 = vld [vmem:[%s1233_s0 + $0x8] sm:$0xff]  ;;  %v1007_v15 = vmov 0.0   ;;  %v71_v21 = vlaneseq }
  0x13   :  { %v44_v2 = vsel %vm43_vm0, %v1069_v0, 0.0  ;;  %v47_v3 = vsel %vm43_vm0, %v1074_v1, 0.0  ;;  %v918_v14 = vld [vmem:[%s1234_s1] sm:$0xff]   ;;  %834 = vmatprep.subr.bf16.mxu0 %v1007_v15  ;;  %854 = vmatprep.subr.bf16.mxu1 %v1007_v15  ;;  %v919_v16 = vld [vmem:[%s1234_s1 + $0x8] sm:$0xff]   ;;  %vm1008_vm1 = vmmov 0   ;;  %s1009_s1 = smov 96  }
  0x14   :  { %45 = vadd.xlane.f32.xlu0 %v44_v2  ;;  %835 = vmatpush3.bf16.msra.mxu0 %v918_v14  ;;  %v1098_v24 = vshrl.u32 %v71_v21, 7  ;;  %v1101_v26 = vld [vmem:[#allocation2] sm:$0xff]  ;;  %v249_v49 = vand.u32 127, %v71_v21  ;;  %vm253_vm3 = vcmask 64512   ;;  %s1010_s19 = smov 64   ;;  %vm283_vm4 = vcmask 1043456  }
  0x15   :  { %838 = vmatprep.mubr.msk.bf16.mxu0 %vm1008_vm1, %v1007_v15  ;;  %836 = vmatprep.subr.bf16.mxu0 %v1007_v15 }
  0x16   :  { %856 = vmatprep.mubr.msk.bf16.mxu1 %vm1008_vm1, %v1007_v15  ;;  %v73_v25 = vsub.s32 0, %v1098_v24  ;;  %v79_v30 = vsub.s32 1, %v1098_v24  ;;  %vm250_vm2 = vcmp.le.s32.totalorder %v249_v49, %v1098_v24 }
  0x18   :  { %48 = vadd.xlane.f32.xlu0 %v47_v3  ;;  %837 = vmatpush3.bf16.msra.mxu0 %v919_v16  ;;  %v74_v29 = vrot.slane %v1101_v26, %v73_v25  ;;  %v80_v34 = vrot.slane %v1101_v26, %v79_v30 }
  0x19   :  { %842 = vmatprep.subr.bf16.mxu0 %v1007_v15 }
  0xa1   :  { %v46_v4 = vpop.xlane.xlu0 %45 }
  0xa2   :  { %v51_v5 = vmul.f32 0.03125, %v46_v4 }
  0xa4   :  { %v53_v6 = vsub.f32 %v1069_v0, %v51_v5 }
  0xa5   :  { %v49_v7 = vpop.xlane.xlu0 %48 }
  0xa6   :  { %v52_v8 = vmul.f32 0.03125, %v49_v7  ;;  %v55_v9 = vmul.f32 %v53_v6, %v53_v6 }
  0xa8   :  { %v54_v10 = vsub.f32 %v1074_v1, %v52_v8  ;;  %v57_v11 = vsel %vm43_vm0, %v55_v9, 0.0 }
  0xa9   :  { %58 = vadd.xlane.f32.xlu1 %v57_v11 }
  0xaa   :  { %v56_v12 = vmul.f32 %v54_v10, %v54_v10 }
  0xac   :  { %v60_v13 = vsel %vm43_vm0, %v56_v12, 0.0 }
  0xad   :  { %61 = vadd.xlane.f32.xlu1 %v60_v13 }
 0x136   :  { %v59_v17 = vpop.xlane.xlu1 %58 }
 0x137   :  { %v63_v18 = vmul.f32 0.03125, %v59_v17 }
 0x139   :  { %v65_v19 = vadd.f32 1e-05, %v63_v18 }
 0x13a   :  { %v62_v20 = vpop.xlane.xlu1 %61 }
 0x13b   :  { %934 = vrsqrt.f32 %v65_v19  ;;  %v64_v22 = vmul.f32 0.03125, %v62_v20 }
 0x13d   :  { %v66_v23 = vadd.f32 1e-05, %v64_v22 }
 0x13f   :  { %936 = vrsqrt.f32 %v66_v23 }
 0x145   :  { %v935_v27 = vpop.eup %934 }
 0x146   :  { %v69_v28 = vmul.f32 %v935_v27, %v53_v6  ;;  %v920_v27 = vld [vmem:[%s1235_s2] sm:$0xff]  }
 0x148   :  { %v75_v33 = vmul.f32 %v74_v29, %v69_v28  ;;  %v921_v28 = vld [vmem:[%s1235_s2 + $0x8] sm:$0xff]  }
 0x149   :  { %v937_v31 = vpop.eup %936 }
 0x14a   :  { %v70_v32 = vmul.f32 %v937_v31, %v54_v10  ;;  %v81_v36 = vadd.f32 %v80_v34, %v75_v33 }
 0x14c   :  { %v76_v35 = vmul.f32 %v74_v29, %v70_v32 }
 0x14e   :  { %v82_v37 = vadd.f32 %v80_v34, %v76_v35 }
 0x150   :  { %v83_v38 = vpack.c.bf16 %v82_v37, %v81_v36 }
 0x152   :  { %839 = vmatmul.mubr.msk.bf16.vlgmr.msra.gmra.mrb[0].mxu0 %vm43_vm0, %v83_v38 }
 0x153   :  { %844 = vmatprep.mubr.msk.bf16.mxu0 %vm1008_vm1, %v1007_v15 }
 0x225   :  { %v137_v39 = vpop.f32.mrb[0].mxu0 }
 0x226   :  { %v144_v40 = vpack.c.bf16 %v137_v39, %v137_v39  ;;  %v840_v41 = vpop.f32.mrb[1].mxu0 }
 0x227   :  { %v140_v42 = vpop.f32.mrb[2].mxu0 }
 0x228   :  { %v145_v43 = vpack.c.bf16 %v140_v42, %v140_v42  ;;  %147 = vrot.lane.b32.xlu0 %v144_v40, %s1009_s1  ;;  %v841_v44 = vpop.f32.mrb[3].mxu0 }
 0x22a   :  { %196 = vrot.lane.b32.xlu1 %v145_v43, %s1009_s1 }
 0x29a   :  { %v148_v45 = vpop.permute.xlu0 %147 }
 0x29b   :  { %v153_v46 = vsel %vm43_vm0, %v148_v45, 0 }
 0x29c   :  { %843 = vmatpush3.bf16.xpose.msra.mxu0 %v153_v46  ;;  %v197_v47 = vpop.permute.xlu1 %196 }
 0x29d   :  { %848 = vmatprep.subr.bf16.mxu0 %v1007_v15  ;;  %v202_v48 = vsel %vm43_vm0, %v197_v47, 0 }
 0x2a3   :  { %845 = vmatmul.mubr.msk.bf16.vlgmr.msra.gmra.mrb[4].mxu0 %vm43_vm0, %v144_v40 }
 0x2a4   :  { %849 = vmatpush3.bf16.xpose.msra.mxu0 %v202_v48  ;;  %850 = vmatprep.mubr.msk.bf16.mxu0 %vm1008_vm1, %v1007_v15 }
 0x2a5   :  { %860 = vmatprep.subr.bf16.mxu0 %v1007_v15 }
 0x2ab   :  { %851 = vmatmul.mubr.msk.bf16.vlgmr.msra.gmra.mrb[8].mxu0 %vm43_vm0, %v145_v43 }
 0x2ac   :  { %862 = vmatprep.mubr.msk.bf16.mxu0 %vm1008_vm1, %v1007_v15 }
 0x376   :  { %v189_v50 = vpop.f32.mrb[4].mxu0 }
 0x377   :  { %v244_v51 = vmul.f32 0.17677669, %v189_v50  ;;  %v846_v52 = vpop.f32.mrb[5].mxu0 }
 0x378   :  { %v192_v53 = vpop.f32.mrb[6].mxu0 }
 0x379   :  { %v847_v54 = vpop.f32.mrb[7].mxu0  ;;  %v251_v55 = vsel %vm250_vm2, %v244_v51, -1e+30 }
 0x37a   :  { %v254_v56 = vsel %vm253_vm3, %v251_v55, -inf  ;;  %v922_v54 = vld [vmem:[%s1236_s3] sm:$0xff]  }
 0x37b   :  { %255 = vmax.xlane.f32.xlu1 %v254_v56 }
 0x37e   :  { %v238_v57 = vpop.f32.mrb[8].mxu0 }
 0x37f   :  { %v245_v58 = vmul.f32 0.17677669, %v238_v57  ;;  %v852_v59 = vpop.f32.mrb[9].mxu0 }
 0x380   :  { %v241_v60 = vpop.f32.mrb[10].mxu0 }
 0x381   :  { %v853_v61 = vpop.f32.mrb[11].mxu0  ;;  %v252_v62 = vsel %vm250_vm2, %v245_v58, -1e+30 }
 0x382   :  { %v257_v63 = vsel %vm253_vm3, %v252_v62, -inf }
 0x383   :  { %258 = vmax.xlane.f32.xlu0 %v257_v63 }
 0x408   :  { %v256_v2 = vpop.xlane.xlu1 %255 }
 0x409   :  { %v260_v3 = vsub.f32 %v251_v55, %v256_v2  ;;  %v923_v55 = vld [vmem:[%s1236_s3 + $0x8] sm:$0xff]   ;;  %v472_v2 = vsub.s32 3, %v1098_v24 }
 0x40b   :  { %v262_v4 = vmul.f32 1.442695, %v260_v3 }
 0x40d   :  { %938 = vpow2.f32 %v262_v4 }
 0x410   :  { %v259_v5 = vpop.xlane.xlu0 %258 }
 0x411   :  { %v261_v6 = vsub.f32 %v252_v62, %v259_v5  ;;  %v466_v62 = vsub.s32 2, %v1098_v24 }
 0x413   :  { %v264_v7 = vmul.f32 1.442695, %v261_v6  ;;  %v467_v63 = vrot.slane %v1101_v26, %v466_v62 }
 0x415   :  { %940 = vpow2.f32 %v264_v7 }
 0x417   :  { %v939_v8 = vpop.eup %938 }
 0x418   :  { %v266_v9 = vsel %vm253_vm3, %v939_v8, 0.0 }
 0x419   :  { %267 = vadd.xlane.f32.xlu0 %v266_v9 }
 0x41f   :  { %v941_v10 = vpop.eup %940 }
 0x420   :  { %v269_v11 = vsel %vm253_vm3, %v941_v10, 0.0 }
 0x421   :  { %270 = vadd.xlane.f32.xlu1 %v269_v11 }
 0x42f   :  { %278 = vrot.lane.b32.xlu0 %v144_v40, %s1010_s19 }
 0x432   :  { %327 = vrot.lane.b32.xlu1 %v145_v43, %s1010_s19 }
 0x4a6   :  { %v268_v12 = vpop.xlane.xlu0 %267 }
 0x4a7   :  { %942 = vrcp.f32 %v268_v12 }
 0x4aa   :  { %v279_v13 = vpop.permute.xlu0 %278 }
 0x4ab   :  { %v285_v14 = vsel %vm283_vm4, %v279_v13, 0  ;;  %v924_v13 = vld [vmem:[%s1237_s4] sm:$0xff]  }
 0x4ac   :  { %855 = vmatpush3.bf16.msra.mxu1 %v285_v14  ;;  %v925_v14 = vld [vmem:[%s1237_s4 + $0x8] sm:$0xff]  }
 0x4ad   :  { %866 = vmatprep.subr.bf16.mxu1 %v1007_v15 }
 0x4ae   :  { %v271_v16 = vpop.xlane.xlu1 %270 }
 0x4af   :  { %944 = vrcp.f32 %v271_v16  ;;  %v926_v16 = vld [vmem:[%s1237_s4 + $0x10] sm:$0xff]  }
 0x4b1   :  { %v943_v17 = vpop.eup %942 }
 0x4b2   :  { %v328_v18 = vpop.permute.xlu1 %327  ;;  %v274_v19 = vmul.f32 %v943_v17, %v939_v8  ;;  %v473_v8 = vrot.slane %v1101_v26, %v472_v2  ;;  %v927_v17 = vld [vmem:[%s1237_s4 + $0x18] sm:$0xff]   ;;  %v933_v2 = vld [vmem:[%s1239_s6 + $0x8] sm:$0xff]  }
 0x4b3   :  { %v333_v20 = vsel %vm283_vm4, %v328_v18, 0  ;;  %v928_v18 = vld [vmem:[%s1237_s4 + $0x20] sm:$0xff]  }
 0x4b4   :  { %861 = vmatpush3.bf16.msra.mxu0 %v333_v20  ;;  %v276_v21 = vpack.c.bf16 %v274_v19, %v274_v19  ;;  %v929_v19 = vld [vmem:[%s1237_s4 + $0x28] sm:$0xff]   ;;  %v930_v20 = vld [vmem:[%s1237_s4 + $0x30] sm:$0xff]  }
 0x4b5   :  { %874 = vmatprep.subr.bf16.mxu0 %v1007_v15 }
 0x4b6   :  { %857 = vmatmul.mubr.msk.bf16.vlgmr.msra.gmra.mrb[0].mxu1 %vm253_vm3, %v276_v21  ;;  %v931_v21 = vld [vmem:[%s1237_s4 + $0x38] sm:$0xff]  }
 0x4b7   :  { %870 = vmatprep.mubr.msk.bf16.mxu1 %vm1008_vm1, %v1007_v15  ;;  %867 = vmatpush3.bf16.msra.mxu1 %v920_v27 }
 0x4b8   :  { %868 = vmatprep.subr.bf16.mxu1 %v1007_v15 }
 0x4b9   :  { %v945_v22 = vpop.eup %944 }
 0x4ba   :  { %v275_v23 = vmul.f32 %v945_v22, %v941_v10 }
 0x4bb   :  { %869 = vmatpush3.bf16.msra.mxu1 %v921_v28 }
 0x4bc   :  { %v277_v25 = vpack.c.bf16 %v275_v23, %v275_v23  ;;  %882 = vmatprep.subr.bf16.mxu1 %v1007_v15 }
 0x4be   :  { %863 = vmatmul.mubr.msk.bf16.vlgmr.msra.gmra.mrb[12].mxu0 %vm253_vm3, %v277_v25 }
 0x4bf   :  { %878 = vmatprep.mubr.msk.bf16.mxu0 %vm1008_vm1, %v1007_v15  ;;  %875 = vmatpush3.bf16.msra.mxu0 %v922_v54 }
 0x4c0   :  { %876 = vmatprep.subr.bf16.mxu0 %v1007_v15 }
 0x4c3   :  { %877 = vmatpush3.bf16.msra.mxu0 %v923_v55 }
 0x4c4   :  { %902 = vmatprep.subr.bf16.mxu0 %v1007_v15 }
 0x589   :  { %v321_v29 = vpop.f32.mrb[0].mxu1 }
 0x58a   :  { %v858_v30 = vpop.f32.mrb[1].mxu1 }
 0x58b   :  { %v324_v31 = vpop.f32.mrb[2].mxu1 }
 0x58c   :  { %v859_v32 = vpop.f32.mrb[3].mxu1 }
 0x591   :  { %v369_v33 = vpop.f32.mrb[12].mxu0 }
 0x592   :  { %v375_v34 = vpack.c.bf16 %v369_v33, %v321_v29  ;;  %v864_v35 = vpop.f32.mrb[13].mxu0 }
 0x593   :  { %v372_v36 = vpop.f32.mrb[14].mxu0 }
 0x594   :  { %v865_v37 = vpop.f32.mrb[15].mxu0  ;;  %871 = vmatmul.mubr.msk.bf16.vlgmr.msra.gmra.mrb[4].mxu1 %vm43_vm0, %v375_v34 }
 0x595   :  { %898 = vmatprep.mubr.msk.bf16.mxu1 %vm1008_vm1, %v1007_v15  ;;  %883 = vmatpush3.bf16.msra.mxu1 %v924_v13 }
 0x596   :  { %884 = vmatprep.subr.bf16.mxu1 %v1007_v15 }
 0x599   :  { %885 = vmatpush3.bf16.msra.mxu1 %v925_v14 }
 0x59a   :  { %886 = vmatprep.subr.bf16.mxu1 %v1007_v15 }
 0x59d   :  { %887 = vmatpush3.bf16.msra.mxu1 %v926_v16 }
 0x59e   :  { %888 = vmatprep.subr.bf16.mxu1 %v1007_v15 }
 0x5a1   :  { %889 = vmatpush3.bf16.msra.mxu1 %v927_v17 }
 0x5a2   :  { %890 = vmatprep.subr.bf16.mxu1 %v1007_v15 }
 0x5a5   :  { %891 = vmatpush3.bf16.msra.mxu1 %v928_v18 }
 0x5a6   :  { %892 = vmatprep.subr.bf16.mxu1 %v1007_v15 }
 0x5a9   :  { %893 = vmatpush3.bf16.msra.mxu1 %v929_v19 }
 0x5aa   :  { %894 = vmatprep.subr.bf16.mxu1 %v1007_v15 }
 0x5ad   :  { %895 = vmatpush3.bf16.msra.mxu1 %v930_v20 }
 0x5ae   :  { %896 = vmatprep.subr.bf16.mxu1 %v1007_v15 }
 0x5b1   :  { %897 = vmatpush3.bf16.msra.mxu1 %v931_v21 }
 0x667   :  { %v429_v38 = vpop.f32.mrb[4].mxu1 }
 0x668   :  { %v1144_v39 = vadd.f32 %v429_v38, %v1069_v0  ;;  %v872_v40 = vpop.f32.mrb[5].mxu1 }
 0x669   :  { %v432_v41 = vpop.f32.mrb[6].mxu1 }
 0x66a   :  { %v1147_v42 = vadd.f32 %v432_v41, %v1074_v1  ;;  %v873_v43 = vpop.f32.mrb[7].mxu1  ;;  %v438_v44 = vsel %vm43_vm0, %v1144_v39, 0.0 }
 0x66b   :  { %439 = vadd.xlane.f32.xlu1 %v438_v44 }
 0x66c   :  { %v441_v45 = vsel %vm43_vm0, %v1147_v42, 0.0 }
 0x66d   :  { %442 = vadd.xlane.f32.xlu0 %v441_v45 }
 0x6f8   :  { %v440_v46 = vpop.xlane.xlu1 %439 }
 0x6f9   :  { %v444_v47 = vmul.f32 0.03125, %v440_v46 }
 0x6fa   :  { %v443_v48 = vpop.xlane.xlu0 %442 }
 0x6fb   :  { %v446_v0 = vsub.f32 %v1144_v39, %v444_v47  ;;  %v445_v49 = vmul.f32 0.03125, %v443_v48 }
 0x6fd   :  { %v447_v50 = vsub.f32 %v1147_v42, %v445_v49  ;;  %v448_v51 = vmul.f32 %v446_v0, %v446_v0 }
 0x6ff   :  { %v450_v1 = vsel %vm43_vm0, %v448_v51, 0.0  ;;  %v449_v52 = vmul.f32 %v447_v50, %v447_v50 }
 0x700   :  { %451 = vadd.xlane.f32.xlu0 %v450_v1 }
 0x701   :  { %v453_v53 = vsel %vm43_vm0, %v449_v52, 0.0 }
 0x702   :  { %454 = vadd.xlane.f32.xlu1 %v453_v53 }
 0x78d   :  { %v452_v56 = vpop.xlane.xlu0 %451 }
 0x78e   :  { %v456_v57 = vmul.f32 0.03125, %v452_v56 }
 0x78f   :  { %v455_v58 = vpop.xlane.xlu1 %454 }
 0x790   :  { %v458_v59 = vadd.f32 1e-05, %v456_v57  ;;  %v457_v60 = vmul.f32 0.03125, %v455_v58 }
 0x792   :  { %946 = vrsqrt.f32 %v458_v59  ;;  %v459_v61 = vadd.f32 1e-05, %v457_v60 }
 0x794   :  { %948 = vrsqrt.f32 %v459_v61 }
 0x79c   :  { %v947_v3 = vpop.eup %946 }
 0x79d   :  { %v462_v4 = vmul.f32 %v947_v3, %v446_v0 }
 0x79e   :  { %v949_v5 = vpop.eup %948 }
 0x79f   :  { %v468_v6 = vmul.f32 %v467_v63, %v462_v4  ;;  %v463_v7 = vmul.f32 %v949_v5, %v447_v50 }
 0x7a1   :  { %v469_v9 = vmul.f32 %v467_v63, %v463_v7  ;;  %v474_v10 = vadd.f32 %v473_v8, %v468_v6  ;;  %v932_v63 = vld [vmem:[%s1239_s6] sm:$0xff]   ;;  %s1011_s6 = smov [#allocation5]  }
 0x7a2   :  { %s769_s19 = sshll.u32 %s1011_s6, 4  ;;  %s770_s19 = int_to_ptr.vmem [resolvable:$true] %s769_s19 }
 0x7a3   :  { %v475_v11 = vadd.f32 %v473_v8, %v469_v9  ;;  %v691_v9 = vsub.s32 4, %v1098_v24  ;;  %s980_s20 = scalar_lea.vmem %s770_s19, 256  ;;  %p985_p9 = scmp.lt.s32.totalorder %s770_s19, %s770_s19 }
 0x7a4   :  { %p981_p8 = scmp.ne.s32.totalorder %s770_s19, %s980_s20  ;;  %p986_p10 = scmp.lt.s32.totalorder %s980_s20, %s980_s20 }
 0x7a5   :  { %v476_v12 = vpack.c.bf16 %v475_v11, %v474_v10  ;;  %v692_v10 = vrot.slane %v1101_v26, %v691_v9  ;;  %v697_v11 = vsub.s32 5, %v1098_v24 }
 0x7a6   :  { %p987_p11 = por %p986_p10, %p985_p9 }
 0x7a7   :  { %879 = vmatmul.mubr.msk.bf16.vlgmr.msra.gmra.mrb[16].mxu0 %vm43_vm0, %v476_v12  ;;  %v698_v17 = vrot.slane %v1101_v26, %v697_v11 }
 0x7a8   :  { %906 = vmatprep.mubr.msk.bf16.mxu0 %vm1008_vm1, %v1007_v15  ;;  %903 = vmatpush3.bf16.msra.mxu0 %v932_v63  ;;  %p988_p12 = pnand %p987_p11, %p981_p8 }
 0x7a9   :  { %904 = vmatprep.subr.bf16.mxu0 %v1007_v15 }
 0x7ac   :  { %905 = vmatpush3.bf16.msra.mxu0 %v933_v2 }
 0x87a   :  { %v530_v22 = vpop.f32.mrb[16].mxu0 }
 0x87b   :  { %v537_v23 = vmul.f32 %v530_v22, %v530_v22  ;;  %v880_v25 = vpop.f32.mrb[17].mxu0 }
 0x87c   :  { %v533_v27 = vpop.f32.mrb[18].mxu0 }
 0x87d   :  { %v539_v28 = vmul.f32 %v537_v23, %v530_v22  ;;  %v538_v29 = vmul.f32 %v533_v27, %v533_v27  ;;  %v881_v30 = vpop.f32.mrb[19].mxu0 }
 0x87f   :  { %v541_v31 = vmul.f32 0.044715, %v539_v28  ;;  %v540_v32 = vmul.f32 %v538_v29, %v533_v27 }
 0x881   :  { %v543_v33 = vadd.f32 %v541_v31, %v530_v22  ;;  %v542_v34 = vmul.f32 0.044715, %v540_v32 }
 0x883   :  { %v545_v35 = vmul.f32 0.7978846, %v543_v33  ;;  %v544_v36 = vadd.f32 %v542_v34, %v533_v27 }
 0x885   :  { %950 = vtanh.f32 %v545_v35  ;;  %v546_v37 = vmul.f32 0.7978846, %v544_v36 }
 0x887   :  { %952 = vtanh.f32 %v546_v37 }
 0x88f   :  { %v951_v38 = vpop.eup %950 }
 0x890   :  { %v549_v40 = vadd.f32 1.0, %v951_v38 }
 0x891   :  { %v953_v41 = vpop.eup %952 }
 0x892   :  { %v551_v43 = vmul.f32 0.5, %v549_v40  ;;  %v550_v44 = vadd.f32 1.0, %v953_v41 }
 0x894   :  { %v552_v45 = vmul.f32 0.5, %v550_v44  ;;  %v553_v46 = vmul.f32 %v551_v43, %v530_v22 }
 0x896   :  { %v554_v47 = vmul.f32 %v552_v45, %v533_v27 }
 0x898   :  { %v555_v48 = vpack.c.bf16 %v554_v47, %v553_v46 }
 0x89a   :  { %899 = vmatmul.mubr.bf16.vlgmr.msra.gmra.mrb[8].mxu1 %v555_v48 }
 0x96d   :  { %v654_v0 = vpop.f32.mrb[8].mxu1 }
 0x96e   :  { %v661_v49 = vadd.f32 %v654_v0, %v1144_v39  ;;  %v900_v50 = vpop.f32.mrb[9].mxu1 }
 0x96f   :  { %v657_v51 = vpop.f32.mrb[10].mxu1 }
 0x970   :  { %v662_v1 = vadd.f32 %v657_v51, %v1147_v42  ;;  %v901_v52 = vpop.f32.mrb[11].mxu1  ;;  %v663_v53 = vsel %vm43_vm0, %v661_v49, 0.0 }
 0x971   :  { %664 = vadd.xlane.f32.xlu0 %v663_v53 }
 0x972   :  { %v666_v54 = vsel %vm43_vm0, %v662_v1, 0.0 }
 0x973   :  { %667 = vadd.xlane.f32.xlu1 %v666_v54 }
 0x9fe   :  { %v665_v55 = vpop.xlane.xlu0 %664 }
 0x9ff   :  { %v669_v56 = vmul.f32 0.03125, %v665_v55 }
 0xa00   :  { %v668_v57 = vpop.xlane.xlu1 %667 }
 0xa01   :  { %v671_v58 = vsub.f32 %v661_v49, %v669_v56  ;;  %v670_v59 = vmul.f32 0.03125, %v668_v57 }
 0xa03   :  { %v672_v60 = vsub.f32 %v662_v1, %v670_v59  ;;  %v673_v61 = vmul.f32 %v671_v58, %v671_v58 }
 0xa05   :  { %v675_v39 = vsel %vm43_vm0, %v673_v61, 0.0  ;;  %v674_v62 = vmul.f32 %v672_v60, %v672_v60 }
 0xa06   :  { %676 = vadd.xlane.f32.xlu0 %v675_v39 }
 0xa07   :  { %v678_v42 = vsel %vm43_vm0, %v674_v62, 0.0 }
 0xa08   :  { %679 = vadd.xlane.f32.xlu1 %v678_v42 }
 0xa93   :  { %v677_v3 = vpop.xlane.xlu0 %676 }
 0xa94   :  { %v681_v4 = vmul.f32 0.03125, %v677_v3 }
 0xa95   :  { %v680_v5 = vpop.xlane.xlu1 %679 }
 0xa96   :  { %v683_v6 = vadd.f32 1e-05, %v681_v4  ;;  %v682_v7 = vmul.f32 0.03125, %v680_v5 }
 0xa98   :  { %954 = vrsqrt.f32 %v683_v6  ;;  %v684_v8 = vadd.f32 1e-05, %v682_v7 }
 0xa9a   :  { %956 = vrsqrt.f32 %v684_v8 }
 0xaa2   :  { %v955_v15 = vpop.eup %954 }
 0xaa3   :  { %v687_v12 = vmul.f32 %v955_v15, %v671_v58 }
 0xaa4   :  { %v957_v13 = vpop.eup %956 }
 0xaa5   :  { %v693_v14 = vmul.f32 %v692_v10, %v687_v12  ;;  %v688_v16 = vmul.f32 %v957_v13, %v672_v60 }
 0xaa7   :  { %v694_v18 = vmul.f32 %v692_v10, %v688_v16  ;;  %v699_v19 = vadd.f32 %v698_v17, %v693_v14 }
 0xaa9   :  { %v700_v20 = vadd.f32 %v698_v17, %v694_v18 }
 0xaab   :  { %v701_v21 = vpack.c.bf16 %v700_v20, %v699_v19 }
 0xaad   :  { %907 = vmatmul.mubr.msk.bf16.vlgmr.msra.gmra.mrb[20].mxu0 %vm43_vm0, %v701_v21 }
 0xb80   :  { %v755_v22 = vpop.f32.mrb[20].mxu0 }
 0xb81   :  { %762 = vst [vmem:[#allocation5] sm:$0xff] %v755_v22  ;;  %v908_v23 = vpop.f32.mrb[21].mxu0 }
 0xb82   :  { %v758_v24 = vpop.f32.mrb[22].mxu0 }
 0xb83   :  { %763 = vst [vmem:[#allocation5 + $0x8] sm:$0xff] %v758_v24  ;;  %v909_v25 = vpop.f32.mrb[23].mxu0 }
 0xb84   :  { %991 = shalt.err (!%p988_p12)
}
 0xb85   :  { %s992_s23 = scalar_lea.hbm %s1240_s7, 256 }
 0xb86   :  { %p993_p13 = scmp.ne.s32.totalorder %s1240_s7, %s992_s23  ;;  %p996_p0 = scmp.lt.u32.totalorder %s992_s23, %s1240_s7 }
 0xb88   :  { %p998_p1 = pnand %p996_p0, %p993_p13 }
 0xb8a   :  { %1001 = shalt.err (!%p998_p1)
}
 0xb8b   :  { %s1012_s3 = smov 128   ;;  %s1013_s27 = smov 8  }
 0xb8c   :  { %775 = dma.vmem_to_hbm [thread:$0]  %s770_s19, 256, %s1240_s7, [#allocation4], %s1012_s3, %s1012_s3, %s1013_s27  }
 0xb8d   :  { %1004 = dma.done.wait [#allocation4], 256  }
 0xb8e   :  { %1005 = vsyncadd [#allocation4], 4294967040 }
 0xb8f   :  { %779 = vsyncpa [#allocation3], 1 }
 0xb90   :  { %780 = vsyncpa [#allocation4], 1 }

</bundles_post_ra>
